<compile_context>
chip_gen: v6e
topology: v6e:2x2x1
jax: 0.10.0
libtpu: 0.0.40
codegen_flags: <defaults>
</compile_context>

<pallas_src>
import functools

import jax
import jax.numpy as jnp
from jax import lax
from jax.experimental import pallas as pl
from jax.experimental.pallas import tpu as pltpu

EPS = 1e-5
_LANE = 128
_TARGET_TILE_BYTES = 4 << 20      # ~4 MiB per x tile -> ~16 MiB double-buffered
_FUSED_MAX_BYTES = 4 << 20        # whole-tensor (f32) threshold for fused path
_VMEM_LIMIT = 40 << 20            # explicit scoped-VMEM limit, < 64 MiB (v7x)


def _round_up(x, m):
    return (x + m - 1) // m * m


def _sublane(itemsize):
    # Sublane packing granularity: 8 for 4-byte, 16 for 2-byte, 32 for 1-byte.
    return max(8, 32 // max(int(itemsize), 1))


def _choose_tiles(rows, hw, itemsize):
    sub = _sublane(itemsize)
    if hw <= _LANE:
        hw_tile = hw                                   # equals full dim -> legal
    else:
        hw_tile = min(_round_up(hw, _LANE), 8192)      # multiple of 128 -> legal
    row_budget = max(_TARGET_TILE_BYTES // (hw_tile * int(itemsize)), sub)
    row_tile = min(_round_up(rows, sub), _round_up(row_budget, sub), 512)
    row_tile = max(row_tile, sub)
    # Keep >= 2 row tiles whenever possible so v7x's second TensorCore works.
    if rows > sub and pl.cdiv(rows, row_tile) < 2:
        row_tile = max(sub, _round_up(pl.cdiv(rows, 2), sub))
    return row_tile, hw_tile


# ----------------------------- two-pass kernels -----------------------------

def _stats_kernel(x_ref, sum_ref, sq_ref, *, hw_total, hw_tile, need_mask):
    """Per-row sum and sum-of-squares, accumulated over the HW grid axis."""
    j = pl.program_id(1)
    x = x_ref[...].astype(jnp.float32)
    if need_mask:
        # Ragged last HW tile: zero out-of-bounds lanes before reducing.
        col = j * hw_tile + lax.broadcasted_iota(jnp.int32, x.shape, 1)
        x = jnp.where(col < hw_total, x, 0.0)
    part_sum = jnp.sum(x, axis=-1, keepdims=True)
    part_sq = jnp.sum(x * x, axis=-1, keepdims=True)

    @pl.when(j == 0)
    def _():
        sum_ref[...] = part_sum
        sq_ref[...] = part_sq

    @pl.when(j > 0)
    def _():
        sum_ref[...] += part_sum
        sq_ref[...] += part_sq


def _apply_kernel(x_ref, scale_ref, shift_ref, o_ref):
    """y = x * scale + shift with per-row scale/shift (single FMA chain)."""
    x = x_ref[...].astype(jnp.float32)
    o_ref[...] = (x * scale_ref[...] + shift_ref[...]).astype(o_ref.dtype)


@jax.jit
def _adalin_two_pass(x, rho, gamma, beta):
    N, C, H, W = x.shape
    HW = H * W
    rows = N * C
    x2 = x.reshape(rows, HW)

    row_tile, hw_tile = _choose_tiles(rows, HW, jnp.dtype(x.dtype).itemsize)
    grid = (pl.cdiv(rows, row_tile), pl.cdiv(HW, hw_tile))
    need_mask = (HW % hw_tile) != 0

    # ---- Pass 1: per-row reduction (instance sums), no padding copies ------
    sums, sqsums = pl.pallas_call(
        functools.partial(_stats_kernel, hw_total=HW, hw_tile=hw_tile,
                          need_mask=need_mask),
        out_shape=(
            jax.ShapeDtypeStruct((rows, 1), jnp.float32),
            jax.ShapeDtypeStruct((rows, 1), jnp.float32),
        ),
        grid=grid,
        in_specs=[pl.BlockSpec((row_tile, hw_tile), lambda i, j: (i, j))],
        out_specs=(
            pl.BlockSpec((row_tile, 1), lambda i, j: (i, 0)),
            pl.BlockSpec((row_tile, 1), lambda i, j: (i, 0)),
        ),
        compiler_params=pltpu.CompilerParams(
            dimension_semantics=("parallel", "arbitrary"),
            vmem_limit_bytes=_VMEM_LIMIT),
    )(x2)

    # ---- Tiny O(N*C) stat math in plain JAX --------------------------------
    inst_mean = (sums[:, 0] / HW).reshape(N, C)
    inst_sq = (sqsums[:, 0] / HW).reshape(N, C)
    inst_var = jnp.maximum(inst_sq - inst_mean * inst_mean, 0.0)

    # Layer stats over (N, H, W) per channel (matches x.mean/var([0, 2, 3]))
    # == mean over N of the instance stats (identical HW count per row).
    layer_mean = jnp.mean(inst_mean, axis=0, keepdims=True)       # (1, C)
    layer_sq = jnp.mean(inst_sq, axis=0, keepdims=True)
    layer_var = jnp.maximum(layer_sq - layer_mean * layer_mean, 0.0)

    rho2 = rho.reshape(1, C).astype(jnp.float32)
    gamma2 = gamma.reshape(1, C).astype(jnp.float32)
    beta2 = beta.reshape(1, C).astype(jnp.float32)

    mean = rho2 * inst_mean + (1.0 - rho2) * layer_mean            # (N, C)
    var = jnp.maximum(rho2 * inst_var + (1.0 - rho2) * layer_var, 0.0)
    scale_nc = gamma2 * lax.rsqrt(var + EPS)                       # (N, C)
    shift_nc = beta2 - mean * scale_nc
    scale_r = scale_nc.reshape(rows, 1)
    shift_r = shift_nc.reshape(rows, 1)

    # ---- Pass 2: fused apply, partial edge blocks dropped on writeback -----
    out = pl.pallas_call(
        _apply_kernel,
        out_shape=jax.ShapeDtypeStruct((rows, HW), x.dtype),
        grid=grid,
        in_specs=[
            pl.BlockSpec((row_tile, hw_tile), lambda i, j: (i, j)),
            pl.BlockSpec((row_tile, 1), lambda i, j: (i, 0)),
            pl.BlockSpec((row_tile, 1), lambda i, j: (i, 0)),
        ],
        out_specs=pl.BlockSpec((row_tile, hw_tile), lambda i, j: (i, j)),
        compiler_params=pltpu.CompilerParams(
            dimension_semantics=("parallel", "parallel"),
            vmem_limit_bytes=_VMEM_LIMIT),
    )(x2, scale_r, shift_r)

    return out.reshape(N, C, H, W)


# ------------------------------ fused kernel --------------------------------

def _fused_kernel(x_ref, rho_ref, gamma_ref, beta_ref, o_ref, *, hw, n):
    """Whole tensor resident: stats + blend + apply in one pass."""
    x = x_ref[...].astype(jnp.float32)                         # (N, C, HW)
    inv_hw = 1.0 / hw
    inst_mean = jnp.sum(x, axis=-1, keepdims=True) * inv_hw    # (N, C, 1)
    inst_sq = jnp.sum(x * x, axis=-1, keepdims=True) * inv_hw  # (N, C, 1)
    inst_var = jnp.maximum(inst_sq - inst_mean * inst_mean, 0.0)

    inv_n = 1.0 / n
    layer_mean = jnp.sum(inst_mean, axis=0, keepdims=True) * inv_n   # (1, C, 1)
    layer_sq = jnp.sum(inst_sq, axis=0, keepdims=True) * inv_n
    layer_var = jnp.maximum(layer_sq - layer_mean * layer_mean, 0.0)

    rho = rho_ref[...]                                         # (1, C, 1)
    mean = rho * inst_mean + (1.0 - rho) * layer_mean          # (N, C, 1)
    var = jnp.maximum(rho * inst_var + (1.0 - rho) * layer_var, 0.0)
    scale = gamma_ref[...] * lax.rsqrt(var + EPS)              # (N, C, 1)
    shift = beta_ref[...] - mean * scale
    o_ref[...] = (x * scale + shift).astype(o_ref.dtype)


@jax.jit
def _adalin_fused(x, rho, gamma, beta):
    N, C, H, W = x.shape
    HW = H * W
    x3 = x.reshape(N, C, HW)
    rho3 = rho.reshape(1, C, 1).astype(jnp.float32)
    gamma3 = gamma.reshape(1, C, 1).astype(jnp.float32)
    beta3 = beta.reshape(1, C, 1).astype(jnp.float32)

    out = pl.pallas_call(
        functools.partial(_fused_kernel, hw=HW, n=N),
        out_shape=jax.ShapeDtypeStruct((N, C, HW), x.dtype),
        grid=(1,),
        in_specs=[
            pl.BlockSpec((N, C, HW), lambda i: (0, 0, 0)),
            pl.BlockSpec((1, C, 1), lambda i: (0, 0, 0)),
            pl.BlockSpec((1, C, 1), lambda i: (0, 0, 0)),
            pl.BlockSpec((1, C, 1), lambda i: (0, 0, 0)),
        ],
        out_specs=pl.BlockSpec((N, C, HW), lambda i: (0, 0, 0)),
        compiler_params=pltpu.CompilerParams(
            dimension_semantics=("arbitrary",),
            vmem_limit_bytes=_VMEM_LIMIT),
    )(x3, rho3, gamma3, beta3)
    return out.reshape(N, C, H, W)


# ------------------------------- public API ---------------------------------

def adaptive_layer_instance_norm(x, rho, gamma, beta):
    """AdaLIN forward. x: (N, C, H, W) NCHW; rho/gamma/beta: (1, C, 1, 1)."""
    N, C, H, W = x.shape
    if N * C * H * W * 4 <= _FUSED_MAX_BYTES:
        return _adalin_fused(x, rho, gamma, beta)
    return _adalin_two_pass(x, rho, gamma, beta)


def adalin_reference(x, rho, gamma, beta):
    xf = x.astype(jnp.float32)
    instance_mean = xf.mean(axis=(2, 3), keepdims=True)
    instance_var = xf.var(axis=(2, 3), keepdims=True)             # unbiased=False
    layer_mean = xf.mean(axis=(0, 2, 3), keepdims=True)           # dims [0, 2, 3]
    layer_var = xf.var(axis=(0, 2, 3), keepdims=True)
    mean = rho * instance_mean + (1.0 - rho) * layer_mean
    var = rho * instance_var + (1.0 - rho) * layer_var
    return (gamma * (xf - mean) / jnp.sqrt(var + EPS) + beta).astype(x.dtype)


if __name__ == "__main__":
    key = jax.random.PRNGKey(0)
    kx, kr, kg, kb = jax.random.split(key, 4)

    N, C, H, W = 2, 4, 16, 16
    x = jax.random.normal(kx, (N, C, H, W), dtype=jnp.float32)

    # Module __init__ gives rho=0, gamma=1, beta=0; perturb deterministically
    # so both the instance and layer paths are exercised.
    rho = jax.random.uniform(kr, (1, C, 1, 1), dtype=jnp.float32)
    gamma = jnp.ones((1, C, 1, 1), jnp.float32) + 0.1 * jax.random.normal(kg, (1, C, 1, 1))
    beta = jnp.zeros((1, C, 1, 1), jnp.float32) + 0.1 * jax.random.normal(kb, (1, C, 1, 1))

    ref = adalin_reference(x, rho, gamma, beta)

    # Dispatcher (fused single-pass path for this small shape).
    out = jax.block_until_ready(adaptive_layer_instance_norm(x, rho, gamma, beta))
    assert out.shape == (N, C, H, W)
    assert jnp.allclose(out, ref, atol=1e-4, rtol=1e-4), (
        f"fused: max abs err = {jnp.max(jnp.abs(out - ref))}"
    )

    # Also exercise the tiled two-pass path on the same small input.
    out2 = jax.block_until_ready(_adalin_two_pass(x, rho, gamma, beta))
    assert jnp.allclose(out2, ref, atol=1e-4, rtol=1e-4), (
        f"two-pass: max abs err = {jnp.max(jnp.abs(out2 - ref))}"
    )

    print("KERNEL_OK")
</pallas_src>

<mosaic_0001>
module attributes {stable_mosaic.version = 11 : i64} {
  func.func @_fused_kernel(%arg0: i32, %arg1: memref<2x4x256xf32, #tpu.memory_space<vmem>>, %arg2: memref<1x4x1xf32, #tpu.memory_space<vmem>>, %arg3: memref<1x4x1xf32, #tpu.memory_space<vmem>>, %arg4: memref<1x4x1xf32, #tpu.memory_space<vmem>>, %arg5: memref<2x4x256xf32, #tpu.memory_space<vmem>>) attributes {dimension_semantics = [#tpu.dimension_semantics<arbitrary>], iteration_bounds = array<i64: 1>, scalar_prefetch = 0 : i64, scratch_operands = 0 : i64, tpu.core_type = #tpu.core_type<tc>, window_params = [{pipeline_mode = #tpu.pipeline_mode<synchronous>, transform_indices = @transform_0, window_bounds = array<i64: 2, 4, 256>}, {pipeline_mode = #tpu.pipeline_mode<synchronous>, transform_indices = @transform_1, window_bounds = array<i64: 1, 4, 1>}, {pipeline_mode = #tpu.pipeline_mode<synchronous>, transform_indices = @transform_2, window_bounds = array<i64: 1, 4, 1>}, {pipeline_mode = #tpu.pipeline_mode<synchronous>, transform_indices = @transform_3, window_bounds = array<i64: 1, 4, 1>}, {pipeline_mode = #tpu.pipeline_mode<synchronous>, transform_indices = @transform_4, window_bounds = array<i64: 2, 4, 256>}]} {
    %c0 = arith.constant 0 : index
    %c0_0 = arith.constant 0 : index
    %c0_1 = arith.constant 0 : index
    %0 = vector.load %arg1[%c0, %c0_0, %c0_1] : memref<2x4x256xf32, #tpu.memory_space<vmem>>, vector<2x4x256xf32>
    %cst = arith.constant dense<0.000000e+00> : vector<2x4xf32>
    %1 = vector.multi_reduction <add>, %0, %cst [2] : vector<2x4x256xf32> to vector<2x4xf32>
    %2 = vector.shape_cast %1 : vector<2x4xf32> to vector<2x4x1xf32>
    %cst_2 = arith.constant 3.906250e-03 : f32
    %3 = vector.broadcast %cst_2 : f32 to vector<2x4x1xf32>
    %4 = arith.mulf %2, %3 : vector<2x4x1xf32>
    %5 = arith.mulf %0, %0 : vector<2x4x256xf32>
    %cst_3 = arith.constant dense<0.000000e+00> : vector<2x4xf32>
    %6 = vector.multi_reduction <add>, %5, %cst_3 [2] : vector<2x4x256xf32> to vector<2x4xf32>
    %7 = vector.shape_cast %6 : vector<2x4xf32> to vector<2x4x1xf32>
    %cst_4 = arith.constant 3.906250e-03 : f32
    %8 = vector.broadcast %cst_4 : f32 to vector<2x4x1xf32>
    %9 = arith.mulf %7, %8 : vector<2x4x1xf32>
    %10 = arith.mulf %4, %4 : vector<2x4x1xf32>
    %11 = arith.subf %9, %10 : vector<2x4x1xf32>
    %cst_5 = arith.constant 0.000000e+00 : f32
    %12 = vector.broadcast %cst_5 : f32 to vector<2x4x1xf32>
    %13 = arith.maximumf %11, %12 : vector<2x4x1xf32>
    %cst_6 = arith.constant dense<0.000000e+00> : vector<4x1xf32>
    %14 = vector.multi_reduction <add>, %4, %cst_6 [0] : vector<2x4x1xf32> to vector<4x1xf32>
    %15 = vector.shape_cast %14 : vector<4x1xf32> to vector<1x4x1xf32>
    %cst_7 = arith.constant 5.000000e-01 : f32
    %16 = vector.broadcast %cst_7 : f32 to vector<1x4x1xf32>
    %17 = arith.mulf %15, %16 : vector<1x4x1xf32>
    %cst_8 = arith.constant dense<0.000000e+00> : vector<4x1xf32>
    %18 = vector.multi_reduction <add>, %9, %cst_8 [0] : vector<2x4x1xf32> to vector<4x1xf32>
    %19 = vector.shape_cast %18 : vector<4x1xf32> to vector<1x4x1xf32>
    %cst_9 = arith.constant 5.000000e-01 : f32
    %20 = vector.broadcast %cst_9 : f32 to vector<1x4x1xf32>
    %21 = arith.mulf %19, %20 : vector<1x4x1xf32>
    %22 = arith.mulf %17, %17 : vector<1x4x1xf32>
    %23 = arith.subf %21, %22 : vector<1x4x1xf32>
    %cst_10 = arith.constant 0.000000e+00 : f32
    %24 = vector.broadcast %cst_10 : f32 to vector<1x4x1xf32>
    %25 = arith.maximumf %23, %24 : vector<1x4x1xf32>
    %c0_11 = arith.constant 0 : index
    %c0_12 = arith.constant 0 : index
    %c0_13 = arith.constant 0 : index
    %26 = vector.load %arg2[%c0_11, %c0_12, %c0_13] : memref<1x4x1xf32, #tpu.memory_space<vmem>>, vector<1x4x1xf32>
    %27 = vector.broadcast %26 : vector<1x4x1xf32> to vector<2x4x1xf32>
    %28 = arith.mulf %27, %4 : vector<2x4x1xf32>
    %cst_14 = arith.constant 1.000000e+00 : f32
    %29 = vector.broadcast %cst_14 : f32 to vector<1x4x1xf32>
    %30 = arith.subf %29, %26 : vector<1x4x1xf32>
    %31 = arith.mulf %30, %17 : vector<1x4x1xf32>
    %32 = vector.broadcast %31 : vector<1x4x1xf32> to vector<2x4x1xf32>
    %33 = arith.addf %28, %32 : vector<2x4x1xf32>
    %34 = vector.broadcast %26 : vector<1x4x1xf32> to vector<2x4x1xf32>
    %35 = arith.mulf %34, %13 : vector<2x4x1xf32>
    %cst_15 = arith.constant 1.000000e+00 : f32
    %36 = vector.broadcast %cst_15 : f32 to vector<1x4x1xf32>
    %37 = arith.subf %36, %26 : vector<1x4x1xf32>
    %38 = arith.mulf %37, %25 : vector<1x4x1xf32>
    %39 = vector.broadcast %38 : vector<1x4x1xf32> to vector<2x4x1xf32>
    %40 = arith.addf %35, %39 : vector<2x4x1xf32>
    %cst_16 = arith.constant 0.000000e+00 : f32
    %41 = vector.broadcast %cst_16 : f32 to vector<2x4x1xf32>
    %42 = arith.maximumf %40, %41 : vector<2x4x1xf32>
    %c0_17 = arith.constant 0 : index
    %c0_18 = arith.constant 0 : index
    %c0_19 = arith.constant 0 : index
    %43 = vector.load %arg3[%c0_17, %c0_18, %c0_19] : memref<1x4x1xf32, #tpu.memory_space<vmem>>, vector<1x4x1xf32>
    %cst_20 = arith.constant 9.99999974E-6 : f32
    %44 = vector.broadcast %cst_20 : f32 to vector<2x4x1xf32>
    %45 = arith.addf %42, %44 : vector<2x4x1xf32>
    %46 = math.rsqrt %45 : vector<2x4x1xf32>
    %47 = vector.broadcast %43 : vector<1x4x1xf32> to vector<2x4x1xf32>
    %48 = arith.mulf %47, %46 : vector<2x4x1xf32>
    %c0_21 = arith.constant 0 : index
    %c0_22 = arith.constant 0 : index
    %c0_23 = arith.constant 0 : index
    %49 = vector.load %arg4[%c0_21, %c0_22, %c0_23] : memref<1x4x1xf32, #tpu.memory_space<vmem>>, vector<1x4x1xf32>
    %50 = arith.mulf %33, %48 : vector<2x4x1xf32>
    %51 = vector.broadcast %49 : vector<1x4x1xf32> to vector<2x4x1xf32>
    %52 = arith.subf %51, %50 : vector<2x4x1xf32>
    %53 = vector.broadcast %48 : vector<2x4x1xf32> to vector<2x4x256xf32>
    %54 = arith.mulf %0, %53 : vector<2x4x256xf32>
    %55 = vector.broadcast %52 : vector<2x4x1xf32> to vector<2x4x256xf32>
    %56 = arith.addf %54, %55 : vector<2x4x256xf32>
    %c0_24 = arith.constant 0 : index
    %c0_25 = arith.constant 0 : index
    %c0_26 = arith.constant 0 : index
    %57 = vector.load %arg5[%c0_24, %c0_25, %c0_26] : memref<2x4x256xf32, #tpu.memory_space<vmem>>, vector<2x4x256xf32>
    tpu.vector_store %arg5[%c0_24, %c0_25, %c0_26], %56 {strides = array<i32>} : memref<2x4x256xf32, #tpu.memory_space<vmem>>, vector<2x4x256xf32>,
    return
  }
  func.func @transform_0(%arg0: i32) -> (i32, i32, i32) {
    %c0_i32 = arith.constant 0 : i32
    %c0_i32_0 = arith.constant 0 : i32
    %c0_i32_1 = arith.constant 0 : i32
    %c0_i32_2 = arith.constant 0 : i32
    return %c0_i32, %c0_i32_0, %c0_i32_1 : i32, i32, i32
  }
  func.func @transform_1(%arg0: i32) -> (i32, i32, i32) {
    %c0_i32 = arith.constant 0 : i32
    %c0_i32_0 = arith.constant 0 : i32
    %c0_i32_1 = arith.constant 0 : i32
    %c0_i32_2 = arith.constant 0 : i32
    return %c0_i32, %c0_i32_0, %c0_i32_1 : i32, i32, i32
  }
  func.func @transform_2(%arg0: i32) -> (i32, i32, i32) {
    %c0_i32 = arith.constant 0 : i32
    %c0_i32_0 = arith.constant 0 : i32
    %c0_i32_1 = arith.constant 0 : i32
    %c0_i32_2 = arith.constant 0 : i32
    return %c0_i32, %c0_i32_0, %c0_i32_1 : i32, i32, i32
  }
  func.func @transform_3(%arg0: i32) -> (i32, i32, i32) {
    %c0_i32 = arith.constant 0 : i32
    %c0_i32_0 = arith.constant 0 : i32
    %c0_i32_1 = arith.constant 0 : i32
    %c0_i32_2 = arith.constant 0 : i32
    return %c0_i32, %c0_i32_0, %c0_i32_1 : i32, i32, i32
  }
  func.func @transform_4(%arg0: i32) -> (i32, i32, i32) {
    %c0_i32 = arith.constant 0 : i32
    %c0_i32_0 = arith.constant 0 : i32
    %c0_i32_1 = arith.constant 0 : i32
    %c0_i32_2 = arith.constant 0 : i32
    return %c0_i32, %c0_i32_0, %c0_i32_1 : i32, i32, i32
  }
}

</mosaic_0001>

<bundles_post_ra>
// kernel: _adalin_fused.1
= control target key start
LH: loop header
LB: loop body
LE: loop exit
PB: predicated region body
PF: predicated region fallthrough
CT: control target
= control target key end

     0   :  { %vm25_vm0 = vcmask 1043456   ;;  %v169_v20 = vmov 0   ;;  %s245_s0 = inlined_call_operand.vmem [shape: f32[2,4,256], index: 0, kind: input, shape index: {}]   ;;  %s246_s1 = inlined_call_operand.vmem [shape: f32[1,4,1], index: 1, kind: input, shape index: {}]   ;;  %s247_s2 = inlined_call_operand.vmem [shape: f32[1,4,1], index: 2, kind: input, shape index: {}]   ;;  %s248_s3 = inlined_call_operand.vmem [shape: f32[1,4,1], index: 3, kind: input, shape index: {}]   ;;  %s249_s4 = inlined_call_operand.vmem [shape: f32[2,4,256], index: 4, kind: output, shape index: {}]  }
   0x1   :  { %v199_v0 = vld [vmem:[%s245_s0] sm:$0xff]  ;;  %v204_v1 = vld [vmem:[%s245_s0 + $0x8] sm:$0xff]  ;;  %162 = vset.pattern.permute.xlu1 %v169_v20  ;;  %161 = vset.pattern.permute.xlu0 %v169_v20 }
   0x2   :  { %v21_v2 = vcombine.high %v199_v0, %v199_v0  ;;  %v26_v3 = vsel %vm25_vm0, %v199_v0, 0.0  ;;  %v38_v4 = vmul.f32 %v199_v0, %v199_v0  ;;  %v22_v5 = vcombine.high %v204_v1, %v204_v1  ;;  %v75_v45 = vld [vmem:[%s246_s1] sm:$0xf] }
   0x3   :  { %v31_v6 = vsel %vm25_vm0, %v204_v1, 0.0  ;;  %v39_v7 = vmul.f32 %v204_v1, %v204_v1  ;;  %v78_v46 = vsub.f32 1.0, %v75_v45  ;;  %v89_v58 = vld [vmem:[%s247_s2] sm:$0xf] }
   0x4   :  { %v27_v8 = vsel %vm25_vm0, %v21_v2, 0.0  ;;  %v42_v9 = vcombine.high %v38_v4, %v38_v4  ;;  %v46_v10 = vsel %vm25_vm0, %v38_v4, 0.0  ;;  %v32_v11 = vsel %vm25_vm0, %v22_v5, 0.0  ;;  %v96_v4 = vld [vmem:[%s248_s3] sm:$0xf] }
   0x5   :  { %v28_v12 = vadd.f32 %v27_v8, %v26_v3  ;;  %v43_v13 = vcombine.high %v39_v7, %v39_v7  ;;  %v51_v15 = vsel %vm25_vm0, %v39_v7, 0.0  ;;  %v33_v17 = vadd.f32 %v32_v11, %v31_v6 }
   0x6   :  { %v47_v14 = vsel %vm25_vm0, %v42_v9, 0.0 }
   0x7   :  { %29 = vadd.xlane.f32.xlu0 %v28_v12  ;;  %v48_v16 = vadd.f32 %v47_v14, %v46_v10  ;;  %v52_v18 = vsel %vm25_vm0, %v43_v13, 0.0  ;;  %v170_v10 = vmov 839922192   ;;  %v112_v12 = vlaneseq }
   0x8   :  { %v53_v19 = vadd.f32 %v52_v18, %v51_v15  ;;  %v110_v11 = vunpack.c.l.s4 %v170_v10 }
   0x9   :  { %49 = vadd.xlane.f32.xlu1 %v48_v16  ;;  %v113_v14 = vshrl.u32 %v112_v12, 7 }
   0xa   :  { %v111_v13 = vunpack.c.0.s8 %v110_v11 }
   0xb   :  { %34 = vadd.xlane.f32.xlu0 %v33_v17 }
   0xc   :  { %v114_v15 = vsub.s32 %v111_v13, %v113_v14 }
   0xd   :  { %54 = vadd.xlane.f32.xlu1 %v53_v19 }
  0x90   :  { %v30_v21 = vpop.xlane.xlu0 %29 }
  0x91   :  { %v36_v22 = vmul.f32 0.00390625, %v30_v21 }
  0x92   :  { %v50_v23 = vpop.xlane.xlu1 %49 }
  0x93   :  { %v56_v25 = vmul.f32 0.00390625, %v50_v23  ;;  %v58_v27 = vmul.f32 %v36_v22, %v36_v22  ;;  %v64_v29 = vsel %vm25_vm0, %v36_v22, 0.0  ;;  %v76_v59 = vmul.f32 %v75_v45, %v36_v22 }
  0x94   :  { %v35_v24 = vpop.xlane.xlu0 %34 }
  0x95   :  { %v37_v26 = vmul.f32 0.00390625, %v35_v24  ;;  %v68_v34 = vsel %vm25_vm0, %v56_v25, 0.0  ;;  %v60_v36 = vsub.f32 %v56_v25, %v58_v27 }
  0x96   :  { %v55_v28 = vpop.xlane.xlu1 %54 }
  0x97   :  { %v65_v30 = vsel %vm25_vm0, %v37_v26, 0.0  ;;  %v57_v31 = vmul.f32 0.00390625, %v55_v28  ;;  %v59_v33 = vmul.f32 %v37_v26, %v37_v26  ;;  %v62_v42 = vmax.f32 %v60_v36, 0.0 }
  0x98   :  { %v66_v32 = vadd.f32 %v65_v30, %v64_v29  ;;  %v77_v2 = vmul.f32 %v75_v45, %v37_v26 }
  0x99   :  { %v69_v35 = vsel %vm25_vm0, %v57_v31, 0.0  ;;  %v61_v38 = vsub.f32 %v57_v31, %v59_v33  ;;  %v82_v48 = vmul.f32 %v75_v45, %v62_v42 }
  0x9a   :  { %v67_v37 = vmul.f32 0.5, %v66_v32  ;;  %v70_v39 = vadd.f32 %v69_v35, %v68_v34 }
  0x9b   :  { %v63_v43 = vmax.f32 %v61_v38, 0.0 }
  0x9c   :  { %v71_v40 = vmul.f32 0.5, %v70_v39  ;;  %v72_v41 = vmul.f32 %v67_v37, %v67_v37  ;;  %v79_v57 = vmul.f32 %v78_v46, %v67_v37 }
  0x9d   :  { %v83_v49 = vmul.f32 %v75_v45, %v63_v43 }
  0x9e   :  { %v73_v44 = vsub.f32 %v71_v40, %v72_v41  ;;  %v80_v63 = vadd.f32 %v79_v57, %v76_v59  ;;  %v81_v6 = vadd.f32 %v79_v57, %v77_v2 }
  0xa0   :  { %v74_v47 = vmax.f32 %v73_v44, 0.0 }
  0xa2   :  { %v84_v50 = vmul.f32 %v78_v46, %v74_v47 }
  0xa4   :  { %v85_v51 = vadd.f32 %v84_v50, %v82_v48  ;;  %v86_v52 = vadd.f32 %v84_v50, %v83_v49 }
  0xa6   :  { %v87_v53 = vmax.f32 %v85_v51, 0.0  ;;  %v88_v54 = vmax.f32 %v86_v52, 0.0 }
  0xa8   :  { %v90_v55 = vadd.f32 1e-05, %v87_v53  ;;  %v91_v56 = vadd.f32 1e-05, %v88_v54 }
  0xaa   :  { %165 = vrsqrt.f32 %v90_v55 }
  0xab   :  { %167 = vrsqrt.f32 %v91_v56 }
  0xb7   :  { %v166_v60 = vpop.eup %165 }
  0xb8   :  { %v168_v61 = vpop.eup %167  ;;  %v94_v62 = vmul.f32 %v166_v60, %v89_v58 }
  0xb9   :  { %v95_v3 = vmul.f32 %v168_v61, %v89_v58 }
  0xba   :  { %103 = vperm.xlu0 %161, %v94_v62   ;;  %v97_v5 = vmul.f32 %v94_v62, %v80_v63 }
  0xbb   :  { %107 = vperm.xlu1 %162, %v95_v3   ;;  %v98_v8 = vmul.f32 %v95_v3, %v81_v6 }
  0xbc   :  { %v99_v7 = vsub.f32 %v96_v4, %v97_v5 }
  0xbd   :  { %v100_v9 = vsub.f32 %v96_v4, %v98_v8 }
  0xbf   :  { %129 = vperm.xlu1 %162, %v99_v7  }
  0xc3   :  { %133 = vperm.xlu1 %162, %v100_v9  }
 0x135   :  { %v104_v16 = vpop.permute.xlu0 %103 }
 0x136   :  { %v108_v17 = vpop.permute.xlu1 %107  ;;  %v115_v18 = vrot.slane %v104_v16, %v114_v15 }
 0x137   :  { %v122_v21 = vrot.slane %v108_v17, %v114_v15 }
 0x138   :  { %v125_v20 = vmul.f32 %v115_v18, %v199_v0 }
 0x139   :  { %v126_v25 = vmul.f32 %v122_v21, %v204_v1 }
 0x13a   :  { %v130_v19 = vpop.permute.xlu1 %129 }
 0x13b   :  { %v141_v22 = vrot.slane %v130_v19, %v114_v15 }
 0x13d   :  { %v151_v23 = vadd.f32 %v141_v22, %v125_v20 }
 0x13e   :  { %v134_v24 = vpop.permute.xlu1 %133 }
 0x13f   :  { %153 = vst [vmem:[%s249_s4] sm:$0xff] %v151_v23  ;;  %v148_v26 = vrot.slane %v134_v24, %v114_v15 }
 0x141   :  { %v152_v27 = vadd.f32 %v148_v26, %v126_v25 }
 0x143   :  { %154 = vst [vmem:[%s249_s4 + $0x8] sm:$0xff] %v152_v27 }

</bundles_post_ra>
